<compile_context>
chip_gen: v5e
topology: v5e:2x2
jax: 0.10.0
libtpu: 0.0.40
codegen_flags: <defaults>
</compile_context>

<pallas_src>
import functools

import jax
import jax.numpy as jnp
from jax import lax
from jax.experimental import pallas as pl
from jax.experimental.pallas import tpu as pltpu

_EPS = 1e-12  # torch.nn.functional.normalize default eps


def _neg_cos_sim_kernel(a_ref, b_ref, o_ref, acc_a_ref, acc_b_ref, *,
                        n, m, tn, tm, num_a, num_b, reduction):
    i = pl.program_id(0)

    @pl.when(i == 0)
    def _init():
        acc_a_ref[...] = jnp.zeros_like(acc_a_ref)
        acc_b_ref[...] = jnp.zeros_like(acc_b_ref)

    eps_sq = jnp.float32(_EPS * _EPS)

    def partial_norm_row_sum(x_ref, tile_rows, total_rows):
        # Load (tile_rows, D) tile, L2-normalize each row, return (1, D) row sum.
        x = x_ref[...].astype(jnp.float32)
        if total_rows % tile_rows != 0:
            # Mask rows past the end of the array (zero raw values so padding
            # garbage can never produce NaN/Inf through the normalization).
            rid = lax.broadcasted_iota(jnp.int32, (tile_rows, 1), 0) + i * tile_rows
            x = jnp.where(rid < total_rows, x, 0.0)
        sumsq = jnp.sum(x * x, axis=1, keepdims=True)
        # x / max(||x||, eps)  ==  x * rsqrt(max(sumsq, eps^2))   (EUP rsqrt)
        x_n = x * lax.rsqrt(jnp.maximum(sumsq, eps_sq))
        return jnp.sum(x_n, axis=0, keepdims=True)

    @pl.when(i < num_a)
    def _acc_a():
        acc_a_ref[...] += partial_norm_row_sum(a_ref, tn, n)

    @pl.when(i < num_b)
    def _acc_b():
        acc_b_ref[...] += partial_norm_row_sum(b_ref, tm, m)

    @pl.when(i == pl.num_programs(0) - 1)
    def _finalize():
        s = jnp.sum(acc_a_ref[...] * acc_b_ref[...])
        if reduction == "mean":
            loss = s / jnp.float32(n * m) + jnp.float32(1.0)
        else:  # "sum"
            loss = s / jnp.float32(m) + jnp.float32(n)
        o_ref[0, 0] = loss


def neg_cos_sim_loss(feature_original: jax.Array,
                     feature_negaug: jax.Array,
                     reduction: str = "mean",
                     *,
                     max_tile_rows: int = 512) -> jax.Array:
    """Pallas implementation of NegCosSimLoss.forward. Returns a 0-d f32 scalar."""
    if reduction not in ("mean", "sum"):
        raise ValueError(f"Invalid reduction: {reduction}")

    n, d = feature_original.shape
    m, d2 = feature_negaug.shape
    assert d == d2, "feature dims must match"

    def pick_tile(rows: int) -> int:
        # Full array if small; otherwise a multiple-of-8 row tile (D stays whole).
        return rows if rows <= max_tile_rows else max_tile_rows

    tn = pick_tile(n)
    tm = pick_tile(m)
    num_a = pl.cdiv(n, tn)
    num_b = pl.cdiv(m, tm)
    grid = (max(num_a, num_b),)

    kernel = functools.partial(
        _neg_cos_sim_kernel,
        n=n, m=m, tn=tn, tm=tm, num_a=num_a, num_b=num_b, reduction=reduction)

    bytes_in = (feature_original.size * feature_original.dtype.itemsize
                + feature_negaug.size * feature_negaug.dtype.itemsize)
    cost = pl.CostEstimate(
        flops=4 * (n + m) * d + 2 * d,
        transcendentals=n + m,
        bytes_accessed=bytes_in + 4,
    )

    out = pl.pallas_call(
        kernel,
        out_shape=jax.ShapeDtypeStruct((1, 1), jnp.float32),
        grid_spec=pltpu.PrefetchScalarGridSpec(
            num_scalar_prefetch=0,
            grid=grid,
            in_specs=[
                # Clamp the block index past the last valid tile; the pl.when
                # guard in the kernel skips the (redundant) compute there.
                pl.BlockSpec((tn, d), lambda i: (jnp.minimum(i, num_a - 1), 0)),
                pl.BlockSpec((tm, d), lambda i: (jnp.minimum(i, num_b - 1), 0)),
            ],
            # Scalar reduction result lives in SMEM, written once at the end.
            out_specs=pl.BlockSpec(memory_space=pltpu.MemorySpace.SMEM),
            scratch_shapes=[
                pltpu.VMEM((1, d), jnp.float32),  # running sum of normalized A rows
                pltpu.VMEM((1, d), jnp.float32),  # running sum of normalized B rows
            ],
        ),
        compiler_params=pltpu.CompilerParams(
            dimension_semantics=("arbitrary",)),
        cost_estimate=cost,
    )(feature_original, feature_negaug)
    return out[0, 0]


def _reference(feature_original, feature_negaug, reduction="mean"):
    # Pure-JAX reference mirroring the PyTorch module exactly.
    eps = 1e-12
    a = feature_original.astype(jnp.float32)
    b = feature_negaug.astype(jnp.float32)
    a_n = a / jnp.maximum(jnp.linalg.norm(a, axis=1, keepdims=True), eps)
    b_n = b / jnp.maximum(jnp.linalg.norm(b, axis=1, keepdims=True), eps)
    cos = a_n @ b_n.T + 1.0
    means = jnp.mean(cos, axis=1)
    return jnp.mean(means) if reduction == "mean" else jnp.sum(means)


if __name__ == "__main__":
    key = jax.random.PRNGKey(0)
    k1, k2 = jax.random.split(key)

    # Small shapes consistent with the module: batch=8 samples, hidden=32 features.
    N, M, D = 8, 8, 32
    feature_original = jax.random.normal(k1, (N, D), dtype=jnp.float32)
    feature_negaug = jax.random.normal(k2, (M, D), dtype=jnp.float32)

    for red in ("mean", "sum"):
        loss = jax.block_until_ready(
            neg_cos_sim_loss(feature_original, feature_negaug, reduction=red))
        ref = jax.block_until_ready(
            _reference(feature_original, feature_negaug, red))
        assert jnp.allclose(loss, ref, atol=1e-5, rtol=1e-5), (red, loss, ref)

    print("KERNEL_OK")
</pallas_src>

<mosaic_0001>
module attributes {stable_mosaic.version = 11 : i64} {
  func.func @_neg_cos_sim_kernel(%arg0: i32, %arg1: memref<8x32xf32, #tpu.memory_space<vmem>>, %arg2: memref<8x32xf32, #tpu.memory_space<vmem>>, %arg3: memref<1x1xf32, #tpu.memory_space<smem>>, %arg4: memref<1x32xf32, #tpu.memory_space<vmem>>, %arg5: memref<1x32xf32, #tpu.memory_space<vmem>>) attributes {dimension_semantics = [#tpu.dimension_semantics<arbitrary>], iteration_bounds = array<i64: 1>, scalar_prefetch = 0 : i64, scratch_operands = 2 : i64, tpu.core_type = #tpu.core_type<tc>, window_params = [{transform_indices = @transform_0, window_bounds = array<i64: 8, 32>}, {transform_indices = @transform_1, window_bounds = array<i64: 8, 32>}, {transform_indices = @transform_2, window_bounds = array<i64: 1, 1>}]} {
    %c0_i32 = arith.constant 0 : i32
    %0 = arith.cmpi eq, %arg0, %c0_i32 : i32
    %1 = arith.extui %0 : i1 to i32
    %c0_i32_0 = arith.constant 0 : i32
    %2 = arith.cmpi ne, %1, %c0_i32_0 : i32
    scf.if %2 {
      %cst_7 = arith.constant 0.000000e+00 : f32
      %12 = vector.broadcast %cst_7 : f32 to vector<1x32xf32>
      %c0 = arith.constant 0 : index
      %c0_8 = arith.constant 0 : index
      %13 = vector.load %arg4[%c0, %c0_8] : memref<1x32xf32, #tpu.memory_space<vmem>>, vector<1x32xf32>
      tpu.vector_store %arg4[%c0, %c0_8], %12 {strides = array<i32>} : memref<1x32xf32, #tpu.memory_space<vmem>>, vector<1x32xf32>,
      %cst_9 = arith.constant 0.000000e+00 : f32
      %14 = vector.broadcast %cst_9 : f32 to vector<1x32xf32>
      %c0_10 = arith.constant 0 : index
      %c0_11 = arith.constant 0 : index
      %15 = vector.load %arg5[%c0_10, %c0_11] : memref<1x32xf32, #tpu.memory_space<vmem>>, vector<1x32xf32>
      tpu.vector_store %arg5[%c0_10, %c0_11], %14 {strides = array<i32>} : memref<1x32xf32, #tpu.memory_space<vmem>>, vector<1x32xf32>,
    } else {
    }
    %c1_i32 = arith.constant 1 : i32
    %3 = arith.cmpi slt, %arg0, %c1_i32 : i32
    %4 = arith.extui %3 : i1 to i32
    %cst = arith.constant 1.000000e-24 : f32
    %c0_i32_1 = arith.constant 0 : i32
    %5 = arith.cmpi ne, %4, %c0_i32_1 : i32
    scf.if %5 {
      %c0 = arith.constant 0 : index
      %c0_7 = arith.constant 0 : index
      %12 = vector.load %arg4[%c0, %c0_7] : memref<1x32xf32, #tpu.memory_space<vmem>>, vector<1x32xf32>
      %c0_8 = arith.constant 0 : index
      %c0_9 = arith.constant 0 : index
      %13 = vector.load %arg1[%c0_8, %c0_9] : memref<8x32xf32, #tpu.memory_space<vmem>>, vector<8x32xf32>
      %14 = arith.mulf %13, %13 : vector<8x32xf32>
      %cst_10 = arith.constant dense<0.000000e+00> : vector<8xf32>
      %15 = vector.multi_reduction <add>, %14, %cst_10 [1] : vector<8x32xf32> to vector<8xf32>
      %16 = vector.shape_cast %15 : vector<8xf32> to vector<8x1xf32>
      %17 = vector.broadcast %cst : f32 to vector<8x1xf32>
      %18 = arith.maximumf %16, %17 : vector<8x1xf32>
      %19 = math.rsqrt %18 : vector<8x1xf32>
      %20 = vector.broadcast %19 : vector<8x1xf32> to vector<8x32xf32>
      %21 = arith.mulf %13, %20 : vector<8x32xf32>
      %cst_11 = arith.constant dense<0.000000e+00> : vector<32xf32>
      %22 = vector.multi_reduction <add>, %21, %cst_11 [0] : vector<8x32xf32> to vector<32xf32>
      %23 = vector.shape_cast %22 : vector<32xf32> to vector<1x32xf32>
      %24 = arith.addf %12, %23 : vector<1x32xf32>
      %c0_12 = arith.constant 0 : index
      %c0_13 = arith.constant 0 : index
      %25 = vector.load %arg4[%c0_12, %c0_13] : memref<1x32xf32, #tpu.memory_space<vmem>>, vector<1x32xf32>
      tpu.vector_store %arg4[%c0_12, %c0_13], %24 {strides = array<i32>} : memref<1x32xf32, #tpu.memory_space<vmem>>, vector<1x32xf32>,
    } else {
    }
    %c1_i32_2 = arith.constant 1 : i32
    %6 = arith.cmpi slt, %arg0, %c1_i32_2 : i32
    %7 = arith.extui %6 : i1 to i32
    %cst_3 = arith.constant 1.000000e-24 : f32
    %c0_i32_4 = arith.constant 0 : i32
    %8 = arith.cmpi ne, %7, %c0_i32_4 : i32
    scf.if %8 {
      %c0 = arith.constant 0 : index
      %c0_7 = arith.constant 0 : index
      %12 = vector.load %arg5[%c0, %c0_7] : memref<1x32xf32, #tpu.memory_space<vmem>>, vector<1x32xf32>
      %c0_8 = arith.constant 0 : index
      %c0_9 = arith.constant 0 : index
      %13 = vector.load %arg2[%c0_8, %c0_9] : memref<8x32xf32, #tpu.memory_space<vmem>>, vector<8x32xf32>
      %14 = arith.mulf %13, %13 : vector<8x32xf32>
      %cst_10 = arith.constant dense<0.000000e+00> : vector<8xf32>
      %15 = vector.multi_reduction <add>, %14, %cst_10 [1] : vector<8x32xf32> to vector<8xf32>
      %16 = vector.shape_cast %15 : vector<8xf32> to vector<8x1xf32>
      %17 = vector.broadcast %cst_3 : f32 to vector<8x1xf32>
      %18 = arith.maximumf %16, %17 : vector<8x1xf32>
      %19 = math.rsqrt %18 : vector<8x1xf32>
      %20 = vector.broadcast %19 : vector<8x1xf32> to vector<8x32xf32>
      %21 = arith.mulf %13, %20 : vector<8x32xf32>
      %cst_11 = arith.constant dense<0.000000e+00> : vector<32xf32>
      %22 = vector.multi_reduction <add>, %21, %cst_11 [0] : vector<8x32xf32> to vector<32xf32>
      %23 = vector.shape_cast %22 : vector<32xf32> to vector<1x32xf32>
      %24 = arith.addf %12, %23 : vector<1x32xf32>
      %c0_12 = arith.constant 0 : index
      %c0_13 = arith.constant 0 : index
      %25 = vector.load %arg5[%c0_12, %c0_13] : memref<1x32xf32, #tpu.memory_space<vmem>>, vector<1x32xf32>
      tpu.vector_store %arg5[%c0_12, %c0_13], %24 {strides = array<i32>} : memref<1x32xf32, #tpu.memory_space<vmem>>, vector<1x32xf32>,
    } else {
    }
    %c0_i32_5 = arith.constant 0 : i32
    %9 = arith.cmpi eq, %arg0, %c0_i32_5 : i32
    %10 = arith.extui %9 : i1 to i32
    %c0_i32_6 = arith.constant 0 : i32
    %11 = arith.cmpi ne, %10, %c0_i32_6 : i32
    scf.if %11 {
      %c0 = arith.constant 0 : index
      %c0_7 = arith.constant 0 : index
      %12 = vector.load %arg4[%c0, %c0_7] : memref<1x32xf32, #tpu.memory_space<vmem>>, vector<1x32xf32>
      %c0_8 = arith.constant 0 : index
      %c0_9 = arith.constant 0 : index
      %13 = vector.load %arg5[%c0_8, %c0_9] : memref<1x32xf32, #tpu.memory_space<vmem>>, vector<1x32xf32>
      %14 = arith.mulf %12, %13 : vector<1x32xf32>
      %15 = vector.shape_cast %14 : vector<1x32xf32> to vector<1x1x32xf32>
      %cst_10 = arith.constant dense<0.000000e+00> : vector<1xf32>
      %16 = vector.multi_reduction <add>, %15, %cst_10 [1, 2] : vector<1x1x32xf32> to vector<1xf32>
      %17 = vector.shape_cast %16 : vector<1xf32> to vector<1x1x1xf32>
      %18 = vector.extract %17[0, 0, 0] : f32 from vector<1x1x1xf32>
      %cst_11 = arith.constant 6.400000e+01 : f32
      %19 = arith.divf %18, %cst_11 : f32
      %cst_12 = arith.constant 1.000000e+00 : f32
      %20 = arith.addf %19, %cst_12 : f32
      %c0_13 = arith.constant 0 : index
      %c0_14 = arith.constant 0 : index
      %21 = memref.load %arg3[%c0_13, %c0_14] : memref<1x1xf32, #tpu.memory_space<smem>>
      memref.store %20, %arg3[%c0_13, %c0_14] : memref<1x1xf32, #tpu.memory_space<smem>>
    } else {
    }
    return
  }
  func.func @transform_0(%arg0: i32) -> (i32, i32) {
    %c0_i32 = arith.constant 0 : i32
    %0 = arith.minsi %arg0, %c0_i32 : i32
    %c0_i32_0 = arith.constant 0 : i32
    %c0_i32_1 = arith.constant 0 : i32
    return %0, %c0_i32_0 : i32, i32
  }
  func.func @transform_1(%arg0: i32) -> (i32, i32) {
    %c0_i32 = arith.constant 0 : i32
    %0 = arith.minsi %arg0, %c0_i32 : i32
    %c0_i32_0 = arith.constant 0 : i32
    %c0_i32_1 = arith.constant 0 : i32
    return %0, %c0_i32_0 : i32, i32
  }
  func.func @transform_2(%arg0: i32) -> (i32, i32) {
    %c0_i32 = arith.constant 0 : i32
    %c0_i32_0 = arith.constant 0 : i32
    %c0_i32_1 = arith.constant 0 : i32
    return %c0_i32, %c0_i32_0 : i32, i32
  }
}

</mosaic_0001>

<bundles_post_ra>
// kernel: tpu_custom_call.1
= control target key start
LH: loop header
LB: loop body
LE: loop exit
PB: predicated region body
PF: predicated region fallthrough
CT: control target
= control target key end

     0   :  { %7 = vsyncpa [#allocation5], 0  ;;  %s272_s0 = inlined_call_operand.hbm [shape: f32[8,32], index: 0, kind: input, shape index: {}]   ;;  %s273_s1 = inlined_call_operand.hbm [shape: f32[8,32], index: 1, kind: input, shape index: {}]   ;;  %s274_s2 = inlined_call_operand.hbm [shape: f32[1,1], index: 2, kind: output, shape index: {}]  }
   0x1   :  { %8 = vsyncpa [#allocation8], 0 }
   0x2   :  { %9 = vsyncpa [#allocation6], 0  ;;  %s15_s11 = sshll.u32 %s272_s0, 4  ;;  %s234_s12 = smov [#allocation4]   ;;  %s16_s11 = int_to_ptr.hbm [resolvable:$true] %s15_s11 }
   0x3   :  { %s17_s13 = sshll.u32 %s234_s12, 4  ;;  %s26_s16 = sshll.u32 %s273_s1, 4  ;;  %s18_s13 = int_to_ptr.vmem [resolvable:$true] %s17_s13  ;;  %s27_s16 = int_to_ptr.hbm [resolvable:$true] %s26_s16 }
   0x4   :  { %20 = dma.hbm_to_vmem [thread:$0]  %s16_s11, 128, %s18_s13, [#allocation5]  }
   0x5   :  { %s235_s17 = smov [#allocation7]  }
   0x6   :  { %s28_s18 = sshll.u32 %s235_s17, 4  ;;  %s29_s18 = int_to_ptr.vmem [resolvable:$true] %s28_s18 }
   0x7   :  { %31 = dma.hbm_to_vmem [thread:$0]  %s27_s16, 128, %s29_s18, [#allocation8]  }
   0x8   :  { %228 = dma.done.wait [#allocation5], 128  }
   0x9   :  { %229 = vsyncadd [#allocation5], 4294967168 }
   0xa   :  { %230 = dma.done.wait [#allocation8], 128  }
   0xb   :  { %231 = vsyncadd [#allocation8], 4294967168  ;;  %v52_v0 = vld [vmem:[#allocation4] sm:$0xff]  ;;  %vm54_vm0 = vcmask 261120   ;;  %v81_v2 = vld [vmem:[#allocation7] sm:$0xff]  ;;  %vm44_vm1 = vcmask 253952  }
   0xc   :  { %v53_v1 = vmul.f32 %v52_v0, %v52_v0  ;;  %v82_v4 = vmul.f32 %v81_v2, %v81_v2  ;;  %v236_v6 = vmov 0.0   ;;  %v237_v49 = vmov 64.0   ;;  %s141_s20 = sshll.u32 %s274_s2, 4  ;;  %s238_s24 = smov [#allocation9]   ;;  %s142_s20 = int_to_ptr.hbm [resolvable:$true] %s141_s20 }
   0xd   :  { %45 = vst.msk [vmem:[#allocation2] sm:$0x1] %vm44_vm1, %v236_v6 }
   0xe   :  { %v55_v3 = vsel %vm54_vm0, %v53_v1, 0.0  ;;  %v83_v5 = vsel %vm54_vm0, %v82_v4, 0.0  ;;  %46 = vst.msk [vmem:[#allocation3] sm:$0x1] %vm44_vm1, %v236_v6 }
   0xf   :  { %56 = vadd.xlane.f32.xlu0 %v55_v3 }
  0x14   :  { %v51_v35 = vld [vmem:[#allocation2] sm:$0x1] }
  0x15   :  { %v80_v42 = vld [vmem:[#allocation3] sm:$0x1] }
  0x17   :  { %84 = vadd.xlane.f32.xlu0 %v83_v5 }
  0x82   :  { %v57_v7 = vpop.xlane.xlu0 %56 }
  0x83   :  { %v58_v8 = vmax.f32 %v57_v7, 1e-24 }
  0x85   :  { %162 = vrsqrt.f32 %v58_v8  ;;  %vm65_vm3 = vweird.f32 %v58_v8 }
  0x8a   :  { %v85_v9 = vpop.xlane.xlu0 %84 }
  0x8b   :  { %v163_v10 = vpop.eup %162  ;;  %v86_v11 = vmax.f32 %v85_v9, 1e-24 }
  0x8c   :  { %v60_v12 = vmul.f32 %v163_v10, %v58_v8  ;;  %vm66_vm2 = vweird.f32 %v163_v10 }
  0x8d   :  { %164 = vrsqrt.f32 %v86_v11  ;;  %vm67_vm4 = vmor %vm65_vm3, %vm66_vm2  ;;  %vm93_vm6 = vweird.f32 %v86_v11 }
  0x8e   :  { %v61_v13 = vmul.f32 %v163_v10, %v60_v12  ;;  %166 = vrcp.f32 %v237_v49 }
  0x90   :  { %v62_v14 = vmul.f32 0.5, %v61_v13 }
  0x92   :  { %v63_v15 = vsub.f32 1.5, %v62_v14 }
  0x93   :  { %v165_v16 = vpop.eup %164 }
  0x94   :  { %v64_v17 = vmul.f32 %v163_v10, %v63_v15  ;;  %v88_v18 = vmul.f32 %v165_v16, %v86_v11  ;;  %vm94_vm5 = vweird.f32 %v165_v16  ;;  %v167_v50 = vpop.eup %166 }
  0x95   :  { %vm95_vm7 = vmor %vm93_vm6, %vm94_vm5  ;;  %v125_v51 = vmul.f32 64.0, %v167_v50  ;;  %vm129_vm8 = vweird.f32 %v167_v50 }
  0x96   :  { %v68_v19 = vsel %vm67_vm4, %v163_v10, %v64_v17  ;;  %v89_v20 = vmul.f32 %v165_v16, %v88_v18 }
  0x97   :  { %v69_v21 = vmul.f32 %v68_v19, %v52_v0  ;;  %v126_v52 = vsub.f32 1.0, %v125_v51 }
  0x98   :  { %v90_v22 = vmul.f32 0.5, %v89_v20 }
  0x99   :  { %v70_v23 = vsel %vm54_vm0, %v69_v21, 0.0  ;;  %v127_v56 = vmul.f32 %v167_v50, %v126_v52 }
  0x9a   :  { %v71_v24 = vrot.slane %v70_v23, 4  ;;  %v91_v25 = vsub.f32 1.5, %v90_v22 }
  0x9b   :  { %v128_v59 = vadd.f32 %v167_v50, %v127_v56 }
  0x9c   :  { %v72_v26 = vadd.f32 %v71_v24, %v70_v23  ;;  %v92_v27 = vmul.f32 %v165_v16, %v91_v25 }
  0x9d   :  { %v130_v62 = vsel %vm129_vm8, %v167_v50, %v128_v59 }
  0x9e   :  { %v73_v28 = vrot.slane %v72_v26, 2  ;;  %v96_v29 = vsel %vm95_vm7, %v165_v16, %v92_v27 }
  0x9f   :  { %v97_v30 = vmul.f32 %v96_v29, %v81_v2 }
  0xa0   :  { %v74_v31 = vadd.f32 %v73_v28, %v72_v26 }
  0xa1   :  { %v98_v32 = vsel %vm54_vm0, %v97_v30, 0.0 }
  0xa2   :  { %v75_v33 = vrot.slane %v74_v31, 1  ;;  %v99_v34 = vrot.slane %v98_v32, 4 }
  0xa4   :  { %v76_v36 = vadd.f32 %v75_v33, %v74_v31  ;;  %v100_v37 = vadd.f32 %v99_v34, %v98_v32 }
  0xa6   :  { %v101_v38 = vrot.slane %v100_v37, 2  ;;  %v77_v39 = vadd.f32 %v76_v36, %v51_v35 }
  0xa8   :  { %v102_v40 = vadd.f32 %v101_v38, %v100_v37  ;;  %79 = vst.msk [vmem:[#allocation2] sm:$0x1] %vm44_vm1, %v77_v39 }
  0xaa   :  { %v103_v41 = vrot.slane %v102_v40, 1 }
  0xac   :  { %v104_v43 = vadd.f32 %v103_v41, %v102_v40 }
  0xae   :  { %v105_v44 = vadd.f32 %v104_v43, %v80_v42 }
  0xaf   :  { %v110_v45 = vld [vmem:[#allocation2] sm:$0x1] }
  0xb0   :  { %106 = vst.msk [vmem:[#allocation3] sm:$0x1] %vm44_vm1, %v105_v44 }
  0xb7   :  { %v111_v46 = vld [vmem:[#allocation3] sm:$0x1] }
  0xb8   :  { %v112_v47 = vmul.f32 %v111_v46, %v110_v45 }
  0xba   :  { %v114_v48 = vsel %vm44_vm1, %v112_v47, 0.0 }
  0xbb   :  { %115 = vadd.xlane.f32.xlu1 %v114_v48 }
 0x12e   :  { %v116_v53 = vpop.xlane.xlu1 %115 }
 0x12f   :  { %v117_v54 = vrot.slane %v116_v53, 4 }
 0x131   :  { %v118_v55 = vadd.f32 %v117_v54, %v116_v53 }
 0x133   :  { %v119_v57 = vrot.slane %v118_v55, 2 }
 0x135   :  { %v120_v58 = vadd.f32 %v119_v57, %v118_v55 }
 0x137   :  { %v121_v60 = vrot.slane %v120_v58, 1 }
 0x139   :  { %v122_v61 = vadd.f32 %v121_v60, %v120_v58 }
 0x13b   :  { %153 = vpush %v122_v61 }
 0x13c   :  { %155 = vpush %v130_v62 }
 0x16c   :  { %s154_s0 = spop %153 }
 0x16d   :  { %s156_s21 = spop %155 }
 0x16e   :  { %s132_s22 = smul.f32 %s156_s21, %s154_s0 }
 0x170   :  { %s133_s23 = sadd.f32 1.0, %s132_s22 }
 0x172   :  { %135 = sst [smem:[#allocation9]] %s133_s23 }
 0x173   :  { %144 = dma.smem_to_hbm %s238_s24, 16, %s142_s20, [#allocation6]  }
 0x174   :  { %232 = dma.done.wait [#allocation6], 16  }
 0x175   :  { %233 = vsyncadd [#allocation6], 4294967280 }
 0x176   :  { %149 = sfence }
 0x177   :  { %150 = vsyncpa [#allocation5], 1 }
 0x178   :  { %151 = vsyncpa [#allocation8], 1 }
 0x179   :  { %152 = vsyncpa [#allocation6], 1 }

</bundles_post_ra>
